<compile_context>
chip_gen: v7x
topology: tpu7x:2x2x1
jax: 0.10.0
libtpu: 0.0.40
codegen_flags: <defaults>
</compile_context>

<pallas_src>
import jax
import jax.numpy as jnp
from jax.experimental import pallas as pl
from jax.experimental.pallas import tpu as pltpu

_LANE = 128
_BLOCK_BYTES_TARGET = 4 << 20   # ~4 MiB per x/out block (Pallas double-buffers)
_VMEM_LIMIT_BYTES = 32 << 20    # explicit scoped-VMEM budget, safe on v5e/v6e/v7x


def _mul_kernel(x_ref, w_ref, o_ref):
    # x_ref: (TN, TF), w_ref: (1, TF), o_ref: (TN, TF).
    # Compute in the (promoted) output dtype; (TN,TF)*(1,TF) is a cheap
    # sublane broadcast on the VPU.
    o_ref[...] = x_ref[...].astype(o_ref.dtype) * w_ref[...].astype(o_ref.dtype)


def _round_up(a, b):
    return (a + b - 1) // b * b


def mul(x, weight):
    """Pallas TPU implementation of `x * weight` with weight broadcast over batch."""
    N = int(x.shape[0])
    assert tuple(weight.shape) == tuple(x.shape[1:]), "weight must match x[1:] dims"
    out_dtype = jnp.promote_types(x.dtype, weight.dtype)

    F = 1
    for d in x.shape[1:]:
        F *= int(d)

    x_item = jnp.dtype(x.dtype).itemsize
    w_item = jnp.dtype(weight.dtype).itemsize
    o_item = jnp.dtype(out_dtype).itemsize
    max_item = max(x_item, o_item)
    min_item = min(x_item, o_item)

    # Dtype-aware sublane multiple: full packed (sub,128) tiles for the
    # narrowest streamed dtype -> unmasked vst on all generations.
    sub = max(8, (8 * 4) // max(1, min_item))

    # --- lane (flattened-feature) tile: multiple of 128 or the full dim ---
    row_floor = N if N < sub else sub
    tf_cap = max(_LANE, (_BLOCK_BYTES_TARGET // (row_floor * max_item)) // _LANE * _LANE)
    TF = F if F <= tf_cap else tf_cap            # ragged edge along F is fine

    # --- sublane (batch) tile: grow toward the block-byte budget ---
    rows = max(1, _BLOCK_BYTES_TARGET // (TF * max_item))
    TN = N if N <= rows else max(sub, rows // sub * sub)   # ragged edge along N is fine

    # If the grid collapsed to one (non-tiny) block, split once so both v7x
    # TensorCores get work under ("parallel", "parallel").
    if pl.cdiv(F, TF) * pl.cdiv(N, TN) == 1 and N * F * max_item >= (2 << 20):
        if F > _LANE:
            TF = _round_up(pl.cdiv(F, 2), _LANE)
        elif N > sub:
            TN = _round_up(pl.cdiv(N, 2), sub)

    # Lane-dense 2D views: reshapes of contiguous arrays are free (no pad/slice).
    x2 = x.reshape(N, F)
    w2 = weight.reshape(1, F)

    # Flat-tile axis OUTER, batch inner -> weight tile resident across the batch loop.
    grid = (pl.cdiv(F, TF), pl.cdiv(N, TN))

    out2 = pl.pallas_call(
        _mul_kernel,
        out_shape=jax.ShapeDtypeStruct((N, F), out_dtype),
        grid_spec=pltpu.PrefetchScalarGridSpec(
            num_scalar_prefetch=0,
            grid=grid,
            in_specs=[
                pl.BlockSpec((TN, TF), lambda f, n: (n, f)),
                # Constant across the inner batch axis -> loaded once per flat tile.
                pl.BlockSpec((1, TF), lambda f, n: (0, f)),
            ],
            out_specs=pl.BlockSpec((TN, TF), lambda f, n: (n, f)),
        ),
        compiler_params=pltpu.CompilerParams(
            dimension_semantics=("parallel", "parallel"),
            vmem_limit_bytes=_VMEM_LIMIT_BYTES,
        ),
        cost_estimate=pl.CostEstimate(
            flops=N * F,
            transcendentals=0,
            bytes_accessed=N * F * (x_item + o_item) + F * w_item,
        ),
    )(x2, w2)

    return out2.reshape(x.shape)


if __name__ == "__main__":
    key = jax.random.PRNGKey(0)
    kx, kw = jax.random.split(key)

    N, C, H, W = 2, 4, 16, 16
    x = jax.random.normal(kx, (N, C, H, W), dtype=jnp.float32)
    # Deterministic "parameter" weight (the torch module stores it from __init__).
    weight = jax.random.normal(kw, (C, H, W), dtype=jnp.float32)

    out = mul(x, weight)
    jax.block_until_ready(out)

    # Sanity check against plain-JAX reference (same broadcasting as torch).
    ref = x * weight[None]
    assert out.shape == ref.shape
    assert out.dtype == ref.dtype
    assert jnp.allclose(out, ref, atol=1e-6), "mismatch vs reference"

    print("KERNEL_OK")
</pallas_src>

<mosaic_0001>
module attributes {stable_mosaic.version = 11 : i64} {
  func.func @_mul_kernel(%arg0: i32, %arg1: i32, %arg2: memref<2x1024xf32, #tpu.memory_space<vmem>>, %arg3: memref<1x1024xf32, #tpu.memory_space<vmem>>, %arg4: memref<2x1024xf32, #tpu.memory_space<vmem>>) attributes {dimension_semantics = [#tpu.dimension_semantics<parallel>, #tpu.dimension_semantics<parallel>], iteration_bounds = array<i64: 1, 1>, scalar_prefetch = 0 : i64, scratch_operands = 0 : i64, tpu.core_type = #tpu.core_type<tc>, window_params = [{transform_indices = @transform_0, window_bounds = array<i64: 2, 1024>}, {transform_indices = @transform_1, window_bounds = array<i64: 1, 1024>}, {transform_indices = @transform_2, window_bounds = array<i64: 2, 1024>}]} {
    %c0 = arith.constant 0 : index
    %c0_0 = arith.constant 0 : index
    %0 = vector.load %arg2[%c0, %c0_0] : memref<2x1024xf32, #tpu.memory_space<vmem>>, vector<2x1024xf32>
    %c0_1 = arith.constant 0 : index
    %c0_2 = arith.constant 0 : index
    %1 = vector.load %arg3[%c0_1, %c0_2] : memref<1x1024xf32, #tpu.memory_space<vmem>>, vector<1x1024xf32>
    %2 = vector.broadcast %1 : vector<1x1024xf32> to vector<2x1024xf32>
    %3 = arith.mulf %0, %2 : vector<2x1024xf32>
    %c0_3 = arith.constant 0 : index
    %c0_4 = arith.constant 0 : index
    %4 = vector.load %arg4[%c0_3, %c0_4] : memref<2x1024xf32, #tpu.memory_space<vmem>>, vector<2x1024xf32>
    tpu.vector_store %arg4[%c0_3, %c0_4], %3 {strides = array<i32>} : memref<2x1024xf32, #tpu.memory_space<vmem>>, vector<2x1024xf32>,
    return
  }
  func.func @transform_0(%arg0: i32, %arg1: i32) -> (i32, i32) {
    %c0_i32 = arith.constant 0 : i32
    return %arg1, %arg0 : i32, i32
  }
  func.func @transform_1(%arg0: i32, %arg1: i32) -> (i32, i32) {
    %c0_i32 = arith.constant 0 : i32
    %c0_i32_0 = arith.constant 0 : i32
    return %c0_i32, %arg0 : i32, i32
  }
  func.func @transform_2(%arg0: i32, %arg1: i32) -> (i32, i32) {
    %c0_i32 = arith.constant 0 : i32
    return %arg1, %arg0 : i32, i32
  }
}

</mosaic_0001>

<bundles_post_ra>
// kernel: tpu_custom_call.1
= control target key start
LH: loop header
LB: loop body
LE: loop exit
PB: predicated region body
PF: predicated region fallthrough
CT: control target
= control target key end

     0   :  { %7 = vsyncpa [#allocation3], 0  ;;  %s259_s0 = inlined_call_operand.hbm [shape: f32[2,1024], index: 0, kind: input, shape index: {}]   ;;  %s260_s1 = inlined_call_operand.hbm [shape: f32[1,1024], index: 1, kind: input, shape index: {}]   ;;  %s261_s2 = inlined_call_operand.hbm [shape: f32[2,1024], index: 2, kind: output, shape index: {}]  }
   0x1   :  { %8 = vsyncpa [#allocation6], 0 }
   0x2   :  { %9 = vsyncpa [#allocation4], 0  ;;  %s204_s9 = smov [#allocation2]   ;;  %s205_s11 = smov [#allocation5]  }
   0x3   :  { %s16_s10 = sshll.u32 %s204_s9, 4  ;;  %s26_s12 = sshll.u32 %s205_s11, 4  ;;  %s17_s10 = int_to_ptr.vmem [resolvable:$true] %s16_s10  ;;  %s27_s12 = int_to_ptr.vmem [resolvable:$true] %s26_s12 }
   0x4   :  { %s132_s15 = scalar_lea.hbm %s259_s0, 256 }
   0x5   :  { %p133_p0 = scmp.ne.s32.totalorder %s259_s0, %s132_s15  ;;  %p136_p1 = scmp.lt.u32.totalorder %s132_s15, %s259_s0 }
   0x7   :  { %p138_p2 = pnand %p136_p1, %p133_p0 }
   0x9   :  { %141 = shalt.err (!%p138_p2)
}
   0xa   :  { %s142_s20 = scalar_lea.vmem %s17_s10, 256  ;;  %p147_p4 = scmp.lt.s32.totalorder %s17_s10, %s17_s10 }
   0xb   :  { %p143_p3 = scmp.ne.s32.totalorder %s17_s10, %s142_s20  ;;  %p148_p5 = scmp.lt.s32.totalorder %s142_s20, %s142_s20 }
   0xd   :  { %p149_p6 = por %p148_p5, %p147_p4 }
   0xf   :  { %p150_p7 = pnand %p149_p6, %p143_p3 }
  0x11   :  { %153 = shalt.err (!%p150_p7)
}
  0x12   :  { %19 = dma.hbm_to_vmem [thread:$0]  %s259_s0, 256, %s17_s10, [#allocation3]  }
  0x13   :  { %s154_s25 = scalar_lea.hbm %s260_s1, 128 }
  0x14   :  { %p155_p8 = scmp.ne.s32.totalorder %s260_s1, %s154_s25  ;;  %p158_p9 = scmp.lt.u32.totalorder %s154_s25, %s260_s1 }
  0x16   :  { %p160_p10 = pnand %p158_p9, %p155_p8 }
  0x18   :  { %163 = shalt.err (!%p160_p10)
}
  0x19   :  { %s164_s30 = scalar_lea.vmem %s27_s12, 128  ;;  %p169_p12 = scmp.lt.s32.totalorder %s27_s12, %s27_s12 }
  0x1a   :  { %p165_p11 = scmp.ne.s32.totalorder %s27_s12, %s164_s30  ;;  %p170_p13 = scmp.lt.s32.totalorder %s164_s30, %s164_s30 }
  0x1c   :  { %p171_p0 = por %p170_p13, %p169_p12 }
  0x1e   :  { %p172_p1 = pnand %p171_p0, %p165_p11 }
  0x20   :  { %175 = shalt.err (!%p172_p1)
}
  0x21   :  { %29 = dma.hbm_to_vmem [thread:$0]  %s260_s1, 128, %s27_s12, [#allocation6]  }
  0x22   :  { %198 = dma.done.wait [#allocation3], 256  }
  0x23   :  { %199 = vsyncadd [#allocation3], 4294967040 }
  0x24   :  { %200 = dma.done.wait [#allocation6], 128  }
  0x25   :  { %201 = vsyncadd [#allocation6], 4294967168  ;;  %v40_v0 = vlaneseq  ;;  %v206_v1 = vmov 1983009808   ;;  %v38_v13 = vld [vmem:[#allocation5] sm:$0xff]  ;;  %v36_v29 = vld [vmem:[#allocation2] sm:$0xff] }
  0x26   :  { %v75_v2 = vunpack.c.l.s4 %v206_v1  ;;  %v37_v33 = vld [vmem:[#allocation2 + $0x8] sm:$0xff]  ;;  %s207_s1 = smov [#allocation7]  }
  0x27   :  { %v41_v3 = vshrl.u32 %v40_v0, 7  ;;  %s118_s4 = sshll.u32 %s207_s1, 4  ;;  %s119_s4 = int_to_ptr.vmem [resolvable:$true] %s118_s4 }
  0x28   :  { %v76_v4 = vunpack.c.0.s8 %v75_v2  ;;  %s176_s5 = scalar_lea.vmem %s119_s4, 256  ;;  %p181_p3 = scmp.lt.s32.totalorder %s119_s4, %s119_s4 }
  0x29   :  { %v42_v5 = vsub.s32 0, %v41_v3  ;;  %v46_v6 = vsub.s32 1, %v41_v3  ;;  %v50_v7 = vsub.s32 2, %v41_v3  ;;  %v54_v8 = vsub.s32 3, %v41_v3  ;;  %p177_p2 = scmp.ne.s32.totalorder %s119_s4, %s176_s5  ;;  %p182_p4 = scmp.lt.s32.totalorder %s176_s5, %s176_s5 }
  0x2a   :  { %v58_v9 = vsub.s32 4, %v41_v3  ;;  %v62_v10 = vsub.s32 5, %v41_v3  ;;  %v66_v11 = vsub.s32 6, %v41_v3  ;;  %v70_v12 = vsub.s32 7, %v41_v3 }
  0x2b   :  { %v79_v14 = vsub.s32 %v76_v4, %v41_v3  ;;  %v43_v15 = vrot.slane %v38_v13, %v42_v5  ;;  %v47_v16 = vrot.slane %v38_v13, %v46_v6  ;;  %v51_v17 = vrot.slane %v38_v13, %v50_v7  ;;  %p183_p5 = por %p182_p4, %p181_p3 }
  0x2c   :  { %v55_v18 = vrot.slane %v38_v13, %v54_v8  ;;  %v59_v19 = vrot.slane %v38_v13, %v58_v9  ;;  %v63_v20 = vrot.slane %v38_v13, %v62_v10  ;;  %v67_v21 = vrot.slane %v38_v13, %v66_v11 }
  0x2d   :  { %v71_v22 = vrot.slane %v38_v13, %v70_v12  ;;  %v72_v23 = vcombine.low %v43_v15, %v47_v16  ;;  %p184_p6 = pnand %p183_p5, %p177_p2 }
  0x2e   :  { %v73_v24 = vcombine.low %v51_v17, %v55_v18  ;;  %v89_v25 = vcombine.low %v59_v19, %v63_v20 }
  0x2f   :  { %v90_v26 = vcombine.low %v67_v21, %v71_v22  ;;  %v80_v27 = vrot.slane %v72_v23, %v79_v14 }
  0x30   :  { %v87_v28 = vrot.slane %v73_v24, %v79_v14  ;;  %v97_v30 = vrot.slane %v89_v25, %v79_v14 }
  0x31   :  { %v104_v31 = vrot.slane %v90_v26, %v79_v14 }
  0x32   :  { %v88_v32 = vcombine.low %v80_v27, %v87_v28 }
  0x33   :  { %v105_v34 = vcombine.low %v97_v30, %v104_v31 }
  0x34   :  { %v108_v35 = vmul.f32 %v88_v32, %v36_v29 }
  0x35   :  { %v109_v36 = vmul.f32 %v105_v34, %v37_v33 }
  0x36   :  { %110 = vst [vmem:[#allocation7] sm:$0xff] %v108_v35 }
  0x37   :  { %111 = vst [vmem:[#allocation7 + $0x8] sm:$0xff] %v109_v36 }
  0x38   :  { %187 = shalt.err (!%p184_p6)
}
  0x39   :  { %s188_s8 = scalar_lea.hbm %s261_s2, 256 }
  0x3a   :  { %p189_p7 = scmp.ne.s32.totalorder %s261_s2, %s188_s8  ;;  %p192_p8 = scmp.lt.u32.totalorder %s188_s8, %s261_s2 }
  0x3c   :  { %p194_p9 = pnand %p192_p8, %p189_p7 }
  0x3e   :  { %197 = shalt.err (!%p194_p9)
}
  0x3f   :  { %121 = dma.vmem_to_hbm [thread:$0]  %s119_s4, 256, %s261_s2, [#allocation4]  }
  0x40   :  { %202 = dma.done.wait [#allocation4], 256  }
  0x41   :  { %203 = vsyncadd [#allocation4], 4294967040 }
  0x42   :  { %125 = vsyncpa [#allocation3], 1 }
  0x43   :  { %126 = vsyncpa [#allocation6], 1 }
  0x44   :  { %127 = vsyncpa [#allocation4], 1 }

</bundles_post_ra>
